<compile_context>
chip_gen: v7x
topology: tpu7x:2x2x1
jax: 0.10.0
libtpu: 0.0.40
codegen_flags: <defaults>
</compile_context>

<pallas_src>
import numpy as np
import jax
import jax.numpy as jnp
from jax.experimental import pallas as pl
from jax.experimental.pallas import tpu as pltpu


# ----------------------------------------------------------------------------
# Pallas kernel: evaluate the spline at TK lambdas for all (lane-padded) dims.
#   lam_ref : (TK, 1)      f32   query lambdas (one tile of the K axis)
#   coef_ref: (4n, Dp)     f32   stacked coefficients [a; b; c; d], resident
#   out_ref : (TK, Dp)     f32   lane-dense output tile
# ----------------------------------------------------------------------------
def spline_eval_kernel(lam_ref, coef_ref, out_ref):
    n = coef_ref.shape[0] // 4
    tk = lam_ref.shape[0]
    inv_n = jnp.float32(1.0 / n)

    lam = lam_ref[...]                                                 # (TK, 1)
    # index = floor(Lambda * n); clamp to n-1 (covers Lambda == 1).
    idx = jnp.minimum(jnp.floor(lam * jnp.float32(n)).astype(jnp.int32), n - 1)

    # Local coordinate within the segment (uniform knots: x[idx] == idx / n).
    t1 = lam - idx.astype(jnp.float32) * inv_n                         # (TK, 1)
    t2 = t1 * t1
    t3 = t2 * t1

    # Fused gather + cubic evaluation as a single matmul:
    #   W[k, p*n + j] = (j == idx_k) * t_k^p ,   coef rows = [a; b; c; d]
    #   (W @ coef)[k, :] = a[idx] + b[idx]*t + c[idx]*t^2 + d[idx]*t^3
    col = jax.lax.broadcasted_iota(jnp.int32, (tk, n), 1)              # (TK, n)
    onehot = (col == idx).astype(jnp.float32)                          # (TK, n)
    w = jnp.concatenate(
        [onehot, onehot * t1, onehot * t2, onehot * t3], axis=1)       # (TK, 4n)

    out_ref[...] = jnp.dot(w, coef_ref[...],
                           preferred_element_type=jnp.float32)         # (TK, Dp)


# ----------------------------------------------------------------------------
# Parameter setup (CubicSpline.compute / populate), vectorised over d in JAX.
# The tridiagonal solve is a length-n scalar recurrence -> lax.scan.
# ----------------------------------------------------------------------------
def compute_spline_coefficients(trajectory):
    a = jnp.asarray(trajectory, jnp.float32)        # (n+1, d)
    n = a.shape[0] - 1
    d = a.shape[1]
    x = jnp.linspace(0.0, 1.0, n + 1, dtype=jnp.float32)
    h = x[1:] - x[:n]                               # (n,)
    alpha = (3.0 / h[1:, None]) * (a[2:] - a[1:n]) \
          - (3.0 / h[:n - 1, None]) * (a[1:n] - a[:n - 1])   # (n-1, d)

    def fwd(carry, inp):
        mu_prev, z_prev = carry
        h_im1, h_i, alpha_im1 = inp
        l_i = 4.0 / n - h_im1 * mu_prev
        mu_i = h_i / l_i
        z_i = (alpha_im1 - h_im1 * z_prev) / l_i
        return (mu_i, z_i), (mu_i, z_i)

    _, (mu_body, z_body) = jax.lax.scan(
        fwd,
        (jnp.float32(0.0), jnp.zeros((d,), jnp.float32)),
        (h[:n - 1], h[1:n], alpha),
    )
    mu = jnp.concatenate([jnp.zeros((1,), jnp.float32), mu_body])          # (n,)
    z = jnp.concatenate([jnp.zeros((1, d), jnp.float32), z_body], axis=0)  # (n, d)

    def bwd(c_next, inp):
        z_j, mu_j = inp
        c_j = z_j - mu_j * c_next
        return c_j, c_j

    _, c_head = jax.lax.scan(bwd, jnp.zeros((d,), jnp.float32),
                             (z, mu), reverse=True)                        # (n, d)
    c = jnp.concatenate([c_head, jnp.zeros((1, d), jnp.float32)], axis=0)  # (n+1, d)

    b = (a[1:] - a[:n]) / h[:, None] - h[:, None] * (c[1:] + 2.0 * c[:n]) / 3.0
    dcoef = (c[1:] - c[:n]) / (3.0 * h[:, None])
    return a[:n], b, c[:n], dcoef


def _round_up(v, m):
    return ((v + m - 1) // m) * m


# ----------------------------------------------------------------------------
# Whole device pipeline under one jit: coefficients + packing + Pallas eval.
# Returns (K, d) spline evaluations, one row per Lambda.
# ----------------------------------------------------------------------------
@jax.jit
def spline_pipeline(trajectory, lambdas):
    a, b, c, dcoef = compute_spline_coefficients(trajectory)
    n, d = a.shape
    K = lambdas.shape[0]

    dp = _round_up(d, 128)                       # lane-dense output width
    if K <= 128:
        kp = _round_up(K, 8)
        tk = kp
    else:
        tk = 128
        kp = _round_up(K, 128)

    def pad_d(m):
        return jnp.pad(m, ((0, 0), (0, dp - d)))

    # Stacked coefficient matrix [a; b; c; d] -> (4n, dp), resident in VMEM.
    coef = jnp.concatenate([pad_d(a), pad_d(b), pad_d(c), pad_d(dcoef)], axis=0)

    lam = jnp.pad(jnp.asarray(lambdas, jnp.float32), (0, kp - K)).reshape(kp, 1)

    evals = pl.pallas_call(
        spline_eval_kernel,
        out_shape=jax.ShapeDtypeStruct((kp, dp), jnp.float32),
        grid=(kp // tk,),
        in_specs=[
            pl.BlockSpec((tk, 1), lambda i: (i, 0)),       # lambdas, blocked on K
            pl.BlockSpec((4 * n, dp), lambda i: (0, 0)),   # coefficients, resident
        ],
        out_specs=pl.BlockSpec((tk, dp), lambda i: (i, 0)),
        compiler_params=pltpu.CompilerParams(
            dimension_semantics=("parallel",)),            # K tiles shard on v7x's 2 TCs
    )(lam, coef)

    return evals[:K, :d]


# ----------------------------------------------------------------------------
# Full forward (mirrors CubicSpline.forward, incl. reset-on-zero semantics).
# The output length depends on the concrete lambda values, so that part is a
# single host-side slice (no per-row Python concat loop, no extra device sync).
# ----------------------------------------------------------------------------
def cubic_spline_forward(trajectory, lambdas):
    lambdas_np = np.asarray(lambdas, dtype=np.float32)
    if np.any(lambdas_np < 0) or np.any(lambdas_np > 1):
        raise ValueError('Lambda Must Be Between The Values Of 0 And 1')

    evals = np.asarray(jax.block_until_ready(
        spline_pipeline(jnp.asarray(trajectory, jnp.float32),
                        jnp.asarray(lambdas_np))))           # (K, d)
    d = evals.shape[1]

    # forward(): `final` resets to one row at every Lambda == 0 and appends
    # otherwise -> equivalent to keeping everything from the LAST zero on, or
    # prepending a zeros row if no Lambda is zero.
    # TODO(synk): dynamic output length (reset/concat on Lambda == 0) has no
    # static-shape Pallas equivalent; resolved with this host-side slice.
    zero_pos = np.nonzero(lambdas_np == 0.0)[0]
    if zero_pos.size > 0:
        return evals[int(zero_pos[-1]):]
    return np.concatenate([np.zeros((1, d), np.float32), evals], axis=0)


# ----------------------------------------------------------------------------
# Pure-numpy reference replicating the torch module exactly (for validation).
# ----------------------------------------------------------------------------
def reference_forward_numpy(trajectory, lambdas):
    traj = np.asarray(trajectory, dtype=np.float32)
    n = traj.shape[0] - 1
    D = traj.shape[1]
    x = np.linspace(0.0, 1.0, n + 1, dtype=np.float32)
    params = []
    for deg in range(D):
        a = traj[:, deg]
        h = x[1:] - x[:n]
        alpha = 3 / h[1:] * (a[2:] - a[1:n]) - 3 / h[:n - 1] * (a[1:n] - a[:n - 1])
        l = np.ones((n + 1,), np.float32)
        mu = np.zeros((n + 1,), np.float32)
        z = np.zeros((n + 1,), np.float32)
        for i in range(1, n):
            l[i] = 4 / n - h[i - 1] * mu[i - 1]
            mu[i] = h[i] / l[i]
            z[i] = (alpha[i - 1] - h[i - 1] * z[i - 1]) / l[i]
        c = np.zeros((n + 1,), np.float32)
        for j in range(n - 1, -1, -1):
            c[j] = z[j] - mu[j] * c[j + 1]
        b = (a[1:] - a[:n]) / h - h * (c[1:] + 2 * c[:n]) / 3
        d = (c[1:] - c[:n]) / (3 * h)
        params.append([a, b, c, d, x])

    def evaluate(L):
        R = np.zeros((1, D), np.float32)
        index = int(np.floor(L * n)) if L < 1.0 else n - 1
        for deg in range(D):
            a, b, c, d, xx = params[deg]
            t = L - xx[index]
            R[0, deg] = a[index] + b[index] * t + c[index] * t * t + d[index] * t ** 3
        return R

    final = np.zeros((1, D), np.float32)
    for L in np.asarray(lambdas, dtype=np.float32):
        if L == 0:
            final = evaluate(L)
        else:
            final = np.concatenate([final, evaluate(L)], axis=0)
    return final


if __name__ == "__main__":
    key = jax.random.PRNGKey(0)
    k1, k2 = jax.random.split(key)

    # Synthetic "trajectory" standing in for read('final.traj'):
    # 9 images (n = 8 segments), d = 12 coordinates per image.
    trajectory = jax.random.normal(k1, (9, 12), dtype=jnp.float32)

    # Case 1: lambdas include 0 (reset path of forward()).
    lambdas1 = np.linspace(0.0, 1.0, 8).astype(np.float32)     # K = 8
    out1 = cubic_spline_forward(trajectory, lambdas1)          # (8, 12)
    ref1 = reference_forward_numpy(np.asarray(trajectory), lambdas1)
    assert out1.shape == ref1.shape, (out1.shape, ref1.shape)
    np.testing.assert_allclose(out1, ref1, rtol=3e-4, atol=3e-4)

    # Case 2: no zero lambda (leading zeros-row path of forward()).
    lambdas2 = np.array([0.2, 0.5, 0.75, 1.0], dtype=np.float32)
    out2 = cubic_spline_forward(trajectory, lambdas2)          # (5, 12)
    ref2 = reference_forward_numpy(np.asarray(trajectory), lambdas2)
    assert out2.shape == ref2.shape, (out2.shape, ref2.shape)
    np.testing.assert_allclose(out2, ref2, rtol=3e-4, atol=3e-4)

    # Case 3: wider state (d = 150 -> two lane tiles) and K = 130 queries
    # (two K tiles, grid = 2) to exercise the tiled / padded paths.
    trajectory3 = jax.random.normal(k2, (9, 150), dtype=jnp.float32)
    lambdas3 = np.linspace(0.0, 1.0, 130).astype(np.float32)
    out3 = cubic_spline_forward(trajectory3, lambdas3)         # (130, 150)
    ref3 = reference_forward_numpy(np.asarray(trajectory3), lambdas3)
    assert out3.shape == ref3.shape, (out3.shape, ref3.shape)
    np.testing.assert_allclose(out3, ref3, rtol=3e-4, atol=3e-4)

    print("KERNEL_OK")
</pallas_src>

<mosaic_0001>
module attributes {stable_mosaic.version = 11 : i64} {
  func.func @spline_eval_kernel(%arg0: i32, %arg1: memref<8x1xf32, #tpu.memory_space<vmem>>, %arg2: memref<32x128xf32, #tpu.memory_space<vmem>>, %arg3: memref<8x128xf32, #tpu.memory_space<vmem>>) attributes {dimension_semantics = [#tpu.dimension_semantics<parallel>], iteration_bounds = array<i64: 1>, scalar_prefetch = 0 : i64, scratch_operands = 0 : i64, tpu.core_type = #tpu.core_type<tc>, window_params = [{transform_indices = @transform_0, window_bounds = array<i64: 8, 1>}, {pipeline_mode = #tpu.pipeline_mode<synchronous>, transform_indices = @transform_1, window_bounds = array<i64: 32, 128>}, {transform_indices = @transform_2, window_bounds = array<i64: 8, 128>}]} {
    %c0 = arith.constant 0 : index
    %c0_0 = arith.constant 0 : index
    %0 = vector.load %arg1[%c0, %c0_0] : memref<8x1xf32, #tpu.memory_space<vmem>>, vector<8x1xf32>
    %cst = arith.constant 8.000000e+00 : f32
    %1 = vector.broadcast %cst : f32 to vector<8x1xf32>
    %2 = arith.mulf %0, %1 : vector<8x1xf32>
    %3 = math.floor %2 : vector<8x1xf32>
    %4 = arith.fptosi %3 : vector<8x1xf32> to vector<8x1xi32>
    %c7_i32 = arith.constant 7 : i32
    %5 = vector.broadcast %c7_i32 : i32 to vector<8x1xi32>
    %6 = arith.minsi %4, %5 : vector<8x1xi32>
    %7 = arith.sitofp %6 : vector<8x1xi32> to vector<8x1xf32>
    %cst_1 = arith.constant 1.250000e-01 : f32
    %8 = vector.broadcast %cst_1 : f32 to vector<8x1xf32>
    %9 = arith.mulf %7, %8 : vector<8x1xf32>
    %10 = arith.subf %0, %9 : vector<8x1xf32>
    %11 = arith.mulf %10, %10 : vector<8x1xf32>
    %12 = arith.mulf %11, %10 : vector<8x1xf32>
    %13 = tpu.iota {dimensions = array<i32: 1>} : vector<8x8xi32>
    %14 = vector.broadcast %6 : vector<8x1xi32> to vector<8x8xi32>
    %15 = arith.cmpi eq, %13, %14 : vector<8x8xi32>
    %16 = arith.extui %15 : vector<8x8xi1> to vector<8x8xi32>
    %17 = arith.sitofp %16 : vector<8x8xi32> to vector<8x8xf32>
    %18 = vector.broadcast %10 : vector<8x1xf32> to vector<8x8xf32>
    %19 = arith.mulf %17, %18 : vector<8x8xf32>
    %20 = vector.broadcast %11 : vector<8x1xf32> to vector<8x8xf32>
    %21 = arith.mulf %17, %20 : vector<8x8xf32>
    %22 = vector.broadcast %12 : vector<8x1xf32> to vector<8x8xf32>
    %23 = arith.mulf %17, %22 : vector<8x8xf32>
    %24 = tpu.concatenate %17, %19, %21, %23 in 1 : vector<8x8xf32>, vector<8x8xf32>, vector<8x8xf32>, vector<8x8xf32> -> vector<8x32xf32>
    %c0_2 = arith.constant 0 : index
    %c0_3 = arith.constant 0 : index
    %25 = vector.load %arg2[%c0_2, %c0_3] : memref<32x128xf32, #tpu.memory_space<vmem>>, vector<32x128xf32>
    %cst_4 = arith.constant dense<0.000000e+00> : vector<8x128xf32>
    %26 = tpu.matmul %24, %25, %cst_4 {dimension_numbers = #tpu.dot_dimension_numbers<[1], [0], [0], [1], [0, 0, 1, 1], [], []>} : vector<8x32xf32>, vector<32x128xf32>, vector<8x128xf32> -> vector<8x128xf32>
    %c0_5 = arith.constant 0 : index
    %c0_6 = arith.constant 0 : index
    %27 = vector.load %arg3[%c0_5, %c0_6] : memref<8x128xf32, #tpu.memory_space<vmem>>, vector<8x128xf32>
    tpu.vector_store %arg3[%c0_5, %c0_6], %26 {strides = array<i32>} : memref<8x128xf32, #tpu.memory_space<vmem>>, vector<8x128xf32>,
    return
  }
  func.func @transform_0(%arg0: i32) -> (i32, i32) {
    %c0_i32 = arith.constant 0 : i32
    %c0_i32_0 = arith.constant 0 : i32
    return %arg0, %c0_i32 : i32, i32
  }
  func.func @transform_1(%arg0: i32) -> (i32, i32) {
    %c0_i32 = arith.constant 0 : i32
    %c0_i32_0 = arith.constant 0 : i32
    %c0_i32_1 = arith.constant 0 : i32
    return %c0_i32, %c0_i32_0 : i32, i32
  }
  func.func @transform_2(%arg0: i32) -> (i32, i32) {
    %c0_i32 = arith.constant 0 : i32
    %c0_i32_0 = arith.constant 0 : i32
    return %arg0, %c0_i32 : i32, i32
  }
}

</mosaic_0001>

<bundles_post_ra>
// kernel: custom-call
= control target key start
LH: loop header
LB: loop body
LE: loop exit
PB: predicated region body
PF: predicated region fallthrough
CT: control target
= control target key end

     0   :  { %s6_s0 = inlined_call_operand.vmem [shape: f32[12], index: 0, kind: output, shape index: {}]  }

// kernel: custom-call.3
= control target key start
LH: loop header
LB: loop body
LE: loop exit
PB: predicated region body
PF: predicated region fallthrough
CT: control target
= control target key end

     0   :  { %s6_s0 = inlined_call_operand.vmem [shape: f32[7,12], index: 0, kind: output, shape index: {}]  }

// kernel: custom-call.2
= control target key start
LH: loop header
LB: loop body
LE: loop exit
PB: predicated region body
PF: predicated region fallthrough
CT: control target
= control target key end

     0   :  { %s6_s0 = inlined_call_operand.vmem [shape: f32[7], index: 0, kind: output, shape index: {}]  }

// kernel: spline_pipeline.1
= control target key start
LH: loop header
LB: loop body
LE: loop exit
PB: predicated region body
PF: predicated region fallthrough
CT: control target
= control target key end

     0   :  { %s270_s0 = inlined_call_operand.vmem [shape: f32[8,1], index: 0, kind: input, shape index: {}]   ;;  %s271_s1 = inlined_call_operand.vmem [shape: f32[32,128], index: 1, kind: input, shape index: {}]   ;;  %s272_s2 = inlined_call_operand.hbm [shape: f32[8,128], index: 2, kind: output, shape index: {}]  }
   0x1   :  { %v12_v0 = vld [vmem:[%s270_s0] sm:$0xff] }
   0x2   :  { %7 = vsyncpa [#allocation3], 0  ;;  %v220_v1 = vmov 0   ;;  %v13_v2 = vmul.f32 8.0, %v12_v0  ;;  %v221_v12 = vmov 0.0|0.0   ;;  %v23_v13 = vlaneseq  ;;  %v67_v14 = vld [vmem:[%s271_s1] sm:$0xff] }
   0x3   :  { %194 = vset.pattern.permute.xlu0 %v220_v1  ;;  %195 = vset.pattern.permute.xlu1 %v220_v1  ;;  %v68_v15 = vld [vmem:[%s271_s1 + $0x8] sm:$0xff]  ;;  %v69_v18 = vld [vmem:[%s271_s1 + $0x10] sm:$0xff]  ;;  %v70_v19 = vld [vmem:[%s271_s1 + $0x18] sm:$0xff]  ;;  %vm222_vm2 = vmmov 0   ;;  %v223_v22 = vmov 0.0   ;;  %s224_s18 = smov 8  }
   0x4   :  { %v14_v3 = vfloor.f32 %v13_v2  ;;  %178 = vmatprep.subr.bf16.mxu0 %v221_v12  ;;  %v179_v16 = vpack.c.bf16 %v68_v15, %v67_v14  ;;  %v24_v17 = vand.u32 127, %v23_v13  ;;  %v182_v20 = vpack.c.bf16 %v70_v19, %v69_v18  ;;  %175 = vmatprep.mubr.msk.f32.mxu0 %vm222_vm2, %v223_v22  ;;  %s225_s19 = smov 16   ;;  %s226_s20 = smov 24  }
   0x5   :  { %vm61_vm3 = vcmask 64512   ;;  %vm63_vm4 = vcmask 130048   ;;  %vm65_vm5 = vcmask 195584   ;;  %vm71_vm6 = vcmask 261120   ;;  %s227_s1 = smov [#allocation2]  }
   0x6   :  { %v184_v4 = vtrunc.f32 %v14_v3  ;;  %180 = vmatpush3.bf16.msra.mxu0 %v179_v16  ;;  %s152_s21 = sshll.u32 %s227_s1, 4  ;;  %s153_s21 = int_to_ptr.vmem [resolvable:$true] %s152_s21 }
   0x7   :  { %181 = vmatprep.subr.bf16.mxu0 %v221_v12  ;;  %s196_s22 = scalar_lea.vmem %s153_s21, 128  ;;  %p201_p1 = scmp.lt.s32.totalorder %s153_s21, %s153_s21 }
   0x8   :  { %v185_v5 = vcvt.f32.s32 %v184_v4  ;;  %p197_p0 = scmp.ne.s32.totalorder %s153_s21, %s196_s22  ;;  %p202_p2 = scmp.lt.s32.totalorder %s196_s22, %s196_s22 }
   0xa   :  { %vm16_vm0 = vcmp.lt.s32.totalorder %v185_v5, 7  ;;  %183 = vmatpush3.bf16.msra.mxu0 %v182_v20  ;;  %p203_p3 = por %p202_p2, %p201_p1 }
   0xb   :  { %v17_v6 = vsel %vm16_vm0, %v185_v5, 7 }
   0xc   :  { %26 = vperm.xlu0 %194, %v17_v6   ;;  %v18_v7 = vcvt.s32.f32 %v17_v6  ;;  %p204_p4 = pnand %p203_p3, %p197_p0 }
   0xe   :  { %v19_v8 = vmul.f32 0.125, %v18_v7 }
  0x10   :  { %v20_v9 = vsub.f32 %v12_v0, %v19_v8 }
  0x12   :  { %33 = vperm.xlu0 %194, %v20_v9   ;;  %v21_v10 = vmul.f32 %v20_v9, %v20_v9 }
  0x14   :  { %39 = vperm.xlu1 %195, %v21_v10   ;;  %v22_v11 = vmul.f32 %v21_v10, %v20_v9 }
  0x18   :  { %45 = vperm.xlu1 %195, %v22_v11  }
  0x8b   :  { %v27_v21 = vpop.permute.xlu0 %26 }
  0x8c   :  { %vm28_vm1 = vcmp.eq.s32.totalorder %v24_v17, %v27_v21 }
  0x8d   :  { %v160_v23 = vsel %vm28_vm1, 1.0, %v223_v22 }
  0x91   :  { %v34_v24 = vpop.permute.xlu0 %33 }
  0x92   :  { %v36_v25 = vmul.f32 %v160_v23, %v34_v24 }
  0x93   :  { %v40_v26 = vpop.permute.xlu1 %39 }
  0x94   :  { %v42_v27 = vmul.f32 %v160_v23, %v40_v26  ;;  %50 = vrot.lane.b32.xlu0 %v36_v25, %s224_s18 }
  0x96   :  { %54 = vrot.lane.b32.xlu1 %v42_v27, %s225_s19 }
  0x97   :  { %v46_v28 = vpop.permute.xlu1 %45 }
  0x98   :  { %v48_v29 = vmul.f32 %v160_v23, %v46_v28 }
  0x9a   :  { %58 = vrot.lane.b32.xlu0 %v48_v29, %s226_s20 }
 0x106   :  { %v51_v30 = vpop.permute.xlu0 %50 }
 0x107   :  { %v62_v31 = vsel %vm61_vm3, %v160_v23, %v51_v30 }
 0x108   :  { %v55_v32 = vpop.permute.xlu1 %54 }
 0x109   :  { %v64_v33 = vsel %vm63_vm4, %v62_v31, %v55_v32 }
 0x10c   :  { %v59_v34 = vpop.permute.xlu0 %58 }
 0x10d   :  { %v66_v35 = vsel %vm65_vm5, %v64_v33, %v59_v34 }
 0x10e   :  { %176 = vmatmul.mubr.msk.f32.vlgmr.msra.gmra.mrb[0].mxu0 %vm71_vm6, %v66_v35 }
 0x1e1   :  { %v141_v36 = vpop.f32.mrb[0].mxu0 }
 0x1e2   :  { %145 = vst [vmem:[#allocation2] sm:$0xff] %v141_v36  ;;  %v177_v37 = vpop.f32.mrb[1].mxu0 }
 0x1e3   :  { %207 = shalt.err (!%p204_p4)
}
 0x1e4   :  { %s208_s25 = scalar_lea.hbm %s272_s2, 128 }
 0x1e5   :  { %p209_p5 = scmp.ne.s32.totalorder %s272_s2, %s208_s25  ;;  %p212_p6 = scmp.lt.u32.totalorder %s208_s25, %s272_s2 }
 0x1e7   :  { %p214_p7 = pnand %p212_p6, %p209_p5 }
 0x1e9   :  { %217 = shalt.err (!%p214_p7)
}
 0x1ea   :  { %155 = dma.vmem_to_hbm [thread:$0]  %s153_s21, 128, %s272_s2, [#allocation3]  }
 0x1eb   :  { %218 = dma.done.wait [#allocation3], 128  }
 0x1ec   :  { %219 = vsyncadd [#allocation3], 4294967168 }
 0x1ed   :  { %159 = vsyncpa [#allocation3], 1 }

</bundles_post_ra>
